<compile_context>
chip_gen: v6e
topology: v6e:2x2x1
jax: 0.10.0
libtpu: 0.0.40
codegen_flags: <defaults>
</compile_context>

<pallas_src>
import functools
import warnings

import jax
import jax.numpy as jnp
from jax.experimental import pallas as pl
from jax.experimental.pallas import tpu as pltpu

warnings.filterwarnings("ignore", message="Some donated buffers were not usable")

_MIB = 1024 * 1024
_TINY_BYPASS_BYTES = 1 * _MIB   # below this, plain XLA fusion beats pallas_call cost


# --------------------------------------------------------------------------- #
# Sinusoidal table (same construction as the PyTorch module, f32).
# --------------------------------------------------------------------------- #
def make_positional_table(max_len, num_hiddens):
    pos = jnp.arange(max_len, dtype=jnp.float32).reshape(-1, 1)
    div = jnp.power(
        10000.0, jnp.arange(0, num_hiddens, 2, dtype=jnp.float32) / num_hiddens
    )
    angles = pos / div                                    # (max_len, hidden//2)
    p = jnp.zeros((max_len, num_hiddens), dtype=jnp.float32)
    p = p.at[:, 0::2].set(jnp.sin(angles))
    p = p.at[:, 1::2].set(jnp.cos(angles))
    return p


# --------------------------------------------------------------------------- #
# Hardware-aware budgets & tile selection.
# --------------------------------------------------------------------------- #
@functools.lru_cache(maxsize=None)
def _tpu_vmem_bytes():
    get_info = getattr(pltpu, "get_tpu_info", None)
    if get_info is not None:
        try:
            vmem = int(getattr(get_info(), "vmem_capacity_bytes", 0) or 0)
            if vmem > 0:
                return vmem
        except Exception:
            pass
    return 128 * _MIB                      # v5e / v6e default


@functools.lru_cache(maxsize=None)
def _budgets():
    """(scoped vmem limit, pipelined tile-footprint budget, #TensorCores/chip)."""
    vmem = _tpu_vmem_bytes()
    if vmem <= 64 * _MIB:                  # v7x-class: 64 MiB per TC, 2 TCs/chip
        return 48 * _MIB, 20 * _MIB, 2
    return 64 * _MIB, 48 * _MIB, 1         # v5e / v6e: 128 MiB, 1 TC


def _sublane_pack(dtype):
    """Rows per physical sublane tile: f32 -> 8, bf16 -> 16, int8/fp8 -> 32."""
    return max(8, (32 // (jnp.dtype(dtype).itemsize * 8)) * 8)


def _pad_to(n, m):
    return ((n + m - 1) // m) * m


def _largest_aligned_divisor(total, align, cap):
    """Largest t <= cap with t % align == 0 and total % t == 0 (0 if none)."""
    if total % align != 0:
        return 0
    n = total // align
    best, d = 0, 1
    while d * d <= n:
        if n % d == 0:
            for q in (d, n // d):
                t = q * align
                if best < t <= cap:
                    best = t
        d += 1
    return best


def _choose_tile(total, align, budget_elems, min_steps):
    """Largest tile along an axis of size `total` that
       (a) fits `budget_elems`, (b) is `align`-aligned or the full extent,
       (c) prefers an exact divisor of `total` (no masked edge block),
       (d) yields >= min_steps grid steps when `total` is large enough."""
    budget_elems = max(int(budget_elems), align)
    cap = min(budget_elems, max(align, pl.cdiv(total, min_steps)))
    if total <= cap:
        return total                       # full extent: always a legal block dim
    t = _largest_aligned_divisor(total, align, cap)
    if t:
        return t
    return max(align, (cap // align) * align)   # aligned; last block is masked


# --------------------------------------------------------------------------- #
# Kernel (shared by both layouts; broadcast over the batch axis, f32 compute).
# --------------------------------------------------------------------------- #
def _posenc_kernel(x_ref, p_ref, o_ref):
    o_ref[...] = (
        x_ref[...].astype(jnp.float32) + p_ref[...].astype(jnp.float32)
    ).astype(o_ref.dtype)


def _posenc_lane_dense(x, p, vmem_limit, tile_budget, num_tc, cost):
    """x viewed as (batch, seq*hidden): wide lane axis (unmasked vst) when
    hidden is small / odd, or when batch already fills the sublanes."""
    batch, seq, hidden = x.shape
    total = seq * hidden
    x_bytes = jnp.dtype(x.dtype).itemsize
    p_bytes = jnp.dtype(p.dtype).itemsize

    # Pipelined footprint per lane of tile: double-buffered x-in + out blocks
    # (batch rows padded to the sublane pack) + double-buffered (1, tile) P
    # block (padded to its sublane pack).
    per_lane = 2 * (
        2 * _pad_to(batch, _sublane_pack(x.dtype)) * x_bytes
        + _sublane_pack(p.dtype) * p_bytes
    )
    min_steps = 8 if num_tc == 2 else 2
    tile = _choose_tile(total, 128, tile_budget // per_lane, min_steps)

    x2 = x.reshape(batch, total)           # contiguous reshape: no data move
    p2 = p.reshape(1, total)
    out2 = pl.pallas_call(
        _posenc_kernel,
        out_shape=jax.ShapeDtypeStruct((batch, total), x.dtype),
        grid_spec=pltpu.PrefetchScalarGridSpec(
            num_scalar_prefetch=0,
            grid=(pl.cdiv(total, tile),),
            in_specs=[
                pl.BlockSpec((batch, tile), lambda i: (0, i)),
                pl.BlockSpec((1, tile), lambda i: (0, i)),
            ],
            out_specs=pl.BlockSpec((batch, tile), lambda i: (0, i)),
        ),
        compiler_params=pltpu.CompilerParams(
            dimension_semantics=("parallel",),
            vmem_limit_bytes=vmem_limit,
        ),
        cost_estimate=cost,
        input_output_aliases={0: 0},
    )(x2, p2)
    return out2.reshape(batch, seq, hidden)


def _posenc_sublane_dense(x, p, vmem_limit, tile_budget, num_tc, cost):
    """x kept as (batch, seq, hidden), tiled over seq in sublane-pack multiples.
    Batch is the inner grid axis, so the P block index is unchanged across it
    and is not re-fetched (P HBM traffic = seq*hidden, not batch*seq*hidden)."""
    batch, seq, hidden = x.shape
    x_bytes = jnp.dtype(x.dtype).itemsize
    p_bytes = jnp.dtype(p.dtype).itemsize
    pack = _sublane_pack(x.dtype)

    per_row = 2 * hidden * (2 * x_bytes + p_bytes)   # dbl-buffered x-in, out, P
    min_steps = 8 if num_tc == 2 else 2
    s_min_steps = max(1, pl.cdiv(min_steps, batch))
    tile_rows = _choose_tile(seq, pack, tile_budget // per_row, s_min_steps)

    grid = (pl.cdiv(seq, tile_rows), batch)          # batch innermost
    return pl.pallas_call(
        _posenc_kernel,
        out_shape=jax.ShapeDtypeStruct((batch, seq, hidden), x.dtype),
        grid_spec=pltpu.PrefetchScalarGridSpec(
            num_scalar_prefetch=0,
            grid=grid,
            in_specs=[
                pl.BlockSpec((1, tile_rows, hidden), lambda s, b: (b, s, 0)),
                pl.BlockSpec((tile_rows, hidden), lambda s, b: (s, 0)),
            ],
            out_specs=pl.BlockSpec((1, tile_rows, hidden), lambda s, b: (b, s, 0)),
        ),
        compiler_params=pltpu.CompilerParams(
            dimension_semantics=("parallel", "parallel"),
            vmem_limit_bytes=vmem_limit,
        ),
        cost_estimate=cost,
        input_output_aliases={0: 0},
    )(x, p)


# --------------------------------------------------------------------------- #
# Public entry point.
# --------------------------------------------------------------------------- #
@functools.partial(jax.jit, static_argnames=("force_pallas",), donate_argnums=(0,))
def positional_encoding(x, p_table, *, force_pallas=False):
    """out = x + P[None, :seq, :]; dropout p=0 -> identity."""
    batch, seq, hidden = x.shape
    assert p_table.shape[0] >= seq and p_table.shape[1] == hidden

    x_bytes = jnp.dtype(x.dtype).itemsize
    # Ship P at activation precision for sub-32-bit activations (halves its HBM
    # traffic); the in-register add is done in f32 either way.
    p_dtype = x.dtype if x_bytes < 4 else p_table.dtype
    p = p_table[:seq, :].astype(p_dtype)

    if (not force_pallas) and x.size * x_bytes < _TINY_BYPASS_BYTES:
        # pallas_call fixed cost dwarfs the work at tiny sizes; plain XLA wins.
        return (x.astype(jnp.float32) + p.astype(jnp.float32)[None]).astype(x.dtype)

    vmem_limit, tile_budget, num_tc = _budgets()
    cost = pl.CostEstimate(
        flops=batch * seq * hidden,
        transcendentals=0,
        bytes_accessed=2 * batch * seq * hidden * x_bytes
        + seq * hidden * jnp.dtype(p_dtype).itemsize,
    )

    if hidden % 128 == 0 and batch < _sublane_pack(x.dtype):
        return _posenc_sublane_dense(x, p, vmem_limit, tile_budget, num_tc, cost)
    return _posenc_lane_dense(x, p, vmem_limit, tile_budget, num_tc, cost)


def _reference(x, p_table):
    seq = x.shape[1]
    return (
        x.astype(jnp.float32) + p_table[None, :seq, :].astype(jnp.float32)
    ).astype(x.dtype)


if __name__ == "__main__":
    max_len = 1000
    key = jax.random.PRNGKey(0)

    # Case 1: module demo shape (batch=2, seq=8, hidden=32) -> lane-dense path.
    b1, s1, h1 = 2, 8, 32
    pt1 = make_positional_table(max_len, h1)
    x1 = jax.random.normal(key, (b1, s1, h1), dtype=jnp.float32)
    ref1 = _reference(x1, pt1)
    out1 = jax.block_until_ready(positional_encoding(x1, pt1, force_pallas=True))
    assert out1.shape == (b1, s1, h1)
    assert jnp.allclose(out1, ref1, atol=1e-5, rtol=1e-5), "lane-dense mismatch"

    # Case 2: hidden % 128 == 0 with tiny batch -> sublane-dense path.
    b2, s2, h2 = 2, 16, 128
    pt2 = make_positional_table(max_len, h2)
    x2 = jax.random.normal(jax.random.fold_in(key, 1), (b2, s2, h2), dtype=jnp.float32)
    ref2 = _reference(x2, pt2)
    out2 = jax.block_until_ready(positional_encoding(x2, pt2, force_pallas=True))
    assert out2.shape == (b2, s2, h2)
    assert jnp.allclose(out2, ref2, atol=1e-5, rtol=1e-5), "sublane-dense mismatch"

    print("KERNEL_OK")
</pallas_src>

<mosaic_0001>
module attributes {stable_mosaic.version = 11 : i64} {
  func.func @_posenc_kernel(%arg0: i32, %arg1: memref<2x128xf32, #tpu.memory_space<vmem>>, %arg2: memref<1x128xf32, #tpu.memory_space<vmem>>, %arg3: memref<2x128xf32, #tpu.memory_space<vmem>>) attributes {dimension_semantics = [#tpu.dimension_semantics<parallel>], iteration_bounds = array<i64: 2>, scalar_prefetch = 0 : i64, scratch_operands = 0 : i64, tpu.core_type = #tpu.core_type<tc>, window_params = [{transform_indices = @transform_0, window_bounds = array<i64: 2, 128>}, {transform_indices = @transform_1, window_bounds = array<i64: 1, 128>}, {transform_indices = @transform_2, window_bounds = array<i64: 2, 128>}]} {
    %c0 = arith.constant 0 : index
    %c0_0 = arith.constant 0 : index
    %0 = vector.load %arg1[%c0, %c0_0] : memref<2x128xf32, #tpu.memory_space<vmem>>, vector<2x128xf32>
    %c0_1 = arith.constant 0 : index
    %c0_2 = arith.constant 0 : index
    %1 = vector.load %arg2[%c0_1, %c0_2] : memref<1x128xf32, #tpu.memory_space<vmem>>, vector<1x128xf32>
    %2 = vector.broadcast %1 : vector<1x128xf32> to vector<2x128xf32>
    %3 = arith.addf %0, %2 : vector<2x128xf32>
    %c0_3 = arith.constant 0 : index
    %c0_4 = arith.constant 0 : index
    %4 = vector.load %arg3[%c0_3, %c0_4] : memref<2x128xf32, #tpu.memory_space<vmem>>, vector<2x128xf32>
    tpu.vector_store %arg3[%c0_3, %c0_4], %3 {strides = array<i32>} : memref<2x128xf32, #tpu.memory_space<vmem>>, vector<2x128xf32>,
    return
  }
  func.func @transform_0(%arg0: i32) -> (i32, i32) {
    %c0_i32 = arith.constant 0 : i32
    %c0_i32_0 = arith.constant 0 : i32
    return %c0_i32, %arg0 : i32, i32
  }
  func.func @transform_1(%arg0: i32) -> (i32, i32) {
    %c0_i32 = arith.constant 0 : i32
    %c0_i32_0 = arith.constant 0 : i32
    return %c0_i32, %arg0 : i32, i32
  }
  func.func @transform_2(%arg0: i32) -> (i32, i32) {
    %c0_i32 = arith.constant 0 : i32
    %c0_i32_0 = arith.constant 0 : i32
    return %c0_i32, %arg0 : i32, i32
  }
}

</mosaic_0001>

<bundles_post_ra>
// kernel: positional_encoding.1
= control target key start
LH: loop header
LB: loop body
LE: loop exit
PB: predicated region body
PF: predicated region fallthrough
CT: control target
= control target key end

     0   :  { %s247_s9 = smov 0   ;;  %s275_s0 = inlined_call_operand.vmem [shape: f32[2,256], index: 0, kind: input, shape index: {}, may-alias: {0,2}]   ;;  %s276_s1 = inlined_call_operand.vmem [shape: f32[1,256], index: 1, kind: input, shape index: {}]   ;;  %s277_s2 = inlined_call_operand.vmem [shape: f32[2,256], index: 2, kind: output, shape index: {}, may-alias: {0,2}]  }
   0x1 LB: > { %s225_s10 = sadd.s32 4294967295, %s249_s9   ;;  %p229_p0 = scmp.ge.s32.totalorder %s249_s9, 1  ;;  %s249_s9 = sphi %s247_s9, %s12_s9  }
   0x2   : > { %p119_p1 = scmp.lt.s32.totalorder %s249_s9, 3 }
   0x4   : > { %p120_p2 = pnand %p229_p0, %p119_p1 }
   0x5   : > { %p142_p3 = scmp.lt.s32.totalorder (!%p120_p2), %s225_s10, 1 }
   0x6   : > { %123 = sbr.rel (%p120_p2) target bundleno = 18 (0x12), region = 28 }
   0xb   : > { %s279_s10 = smov (!%p142_p3, %s225_s10), 1 }
   0xc   : > { %s230_s11 = sshll.u32 %s279_s10, 1  ;;  %s148_s14 = scalar_lea.vmem %s276_s1, %s279_s10 }
   0xd   : > { %s145_s17 = scalar_lea.vmem %s275_s0, %s230_s11  ;;  %v232_v0 = vld [vmem:[%s148_s14] ss:$0 sm:$0xff]  ;;  %s152_s20 = scalar_lea.vmem %s277_s2, %s230_s11 }
   0xe   : > { %v153_v1 = vld [vmem:[%s145_s17] sm:$0x3] }
   0xf   : > { %v161_v2 = vadd.f32 %v232_v0, %v153_v1 }
  0x11   : > { %162 = vst [vmem:[%s152_s20] sm:$0x3] %v161_v2 }
  0x12 PF: > { %s12_s9 = sadd.s32 1, %s249_s9  }
  0x13   : > { %p9_p4 = scmp.ge.s32.totalorder %s12_s9, 4  }
  0x15   :  { %11 = sbr.rel (!%p9_p4) target bundleno = 1 (0x1), region = 61 }

</bundles_post_ra>
